<compile_context>
chip_gen: v7x
topology: tpu7x:2x2x1
jax: 0.10.0
libtpu: 0.0.40
codegen_flags: <defaults>
</compile_context>

<pallas_src>
import jax
import jax.numpy as jnp
from jax.experimental import pallas as pl
from jax.experimental.pallas import tpu as pltpu

HIDDEN1 = 400
HIDDEN2 = 300
OUT = 1

_SUBLANE = 8
H1_PAD = 512    # round_up(400, 128)
H2_PAD = 384    # round_up(300, 128)
OUT_PAD = 128   # round_up(1, 128)  -> lane-dense output store


def _round_up(x, m):
    return (x + m - 1) // m * m


def _critic_kernel(s_ref, a_ref, w1s_ref, w1a_ref, b1_ref,
                   w2_ref, b2_ref, w3_ref, b3_ref, o_ref):
    # Layer 1: split matmul replaces the HBM-level concat(state, action).
    h1 = jnp.dot(s_ref[...], w1s_ref[...], preferred_element_type=jnp.float32)
    h1 = h1 + jnp.dot(a_ref[...], w1a_ref[...], preferred_element_type=jnp.float32)
    h1 = jnp.maximum(h1 + b1_ref[...], 0.0)              # bias + ReLU in f32 (VPU)

    # Layer 2 (400->300, padded 512->384).
    h2 = jnp.dot(h1.astype(w2_ref.dtype), w2_ref[...],
                 preferred_element_type=jnp.float32)
    h2 = jnp.maximum(h2 + b2_ref[...], 0.0)

    # Layer 3 (300->1, padded 384->128): output block is full 128 lanes wide,
    # only column 0 is the real value; extra columns are exact zeros.
    o_ref[...] = (jnp.dot(h2.astype(w3_ref.dtype), w3_ref[...],
                          preferred_element_type=jnp.float32) + b3_ref[...])


def pack_critic_params(params, state_dim, action_dim, compute_dtype=jnp.bfloat16):
    """Pad natural (PyTorch-layout-transposed) params to lane-aligned shapes.

    Natural params: w1 (in,400) b1 (1,400) w2 (400,300) b2 (1,300) w3 (300,1) b3 (1,1).
    Padded rows/columns are exactly zero so the padded forward pass matches the
    original model on the first output column.
    """
    w1, b1 = params["w1"], params["b1"]
    w2, b2 = params["w2"], params["b2"]
    w3, b3 = params["w3"], params["b3"]
    in_dim = state_dim + action_dim
    assert w1.shape == (in_dim, HIDDEN1)

    w1p = jnp.pad(w1.astype(jnp.float32), ((0, 0), (0, H1_PAD - HIDDEN1)))
    return {
        "w1_s": w1p[:state_dim].astype(compute_dtype),
        "w1_a": w1p[state_dim:].astype(compute_dtype),
        "b1": jnp.pad(b1, ((0, 0), (0, H1_PAD - HIDDEN1))).astype(jnp.float32),
        "w2": jnp.pad(w2, ((0, H1_PAD - HIDDEN1), (0, H2_PAD - HIDDEN2))).astype(compute_dtype),
        "b2": jnp.pad(b2, ((0, 0), (0, H2_PAD - HIDDEN2))).astype(jnp.float32),
        "w3": jnp.pad(w3, ((0, H2_PAD - HIDDEN2), (0, OUT_PAD - OUT))).astype(compute_dtype),
        "b3": jnp.pad(b3, ((0, 0), (0, OUT_PAD - OUT))).astype(jnp.float32),
    }


def critic_forward(state, action, packed, *, tb=512, compute_dtype=jnp.bfloat16):
    """Pallas-backed forward pass of the DDPG Critic.

    state  : (B, state_dim)  float array
    action : (B, action_dim) float array
    packed : output of pack_critic_params
    returns: (B, 1) float32
    """
    assert state.ndim == 2 and action.ndim == 2
    assert state.shape[0] == action.shape[0]
    B, state_dim = state.shape
    action_dim = action.shape[1]

    # Pad the batch to a sublane multiple so every batch block is (8k, *).
    b_pad = _round_up(B, _SUBLANE)
    if b_pad != B:
        state = jnp.pad(state, ((0, b_pad - B), (0, 0)))
        action = jnp.pad(action, ((0, b_pad - B), (0, 0)))

    state = state.astype(compute_dtype)
    action = action.astype(compute_dtype)

    tb = min(tb, b_pad)                      # multiple of 8 by construction
    grid = (pl.cdiv(b_pad, tb),)

    def batch_spec(cols):
        return pl.BlockSpec((tb, cols), lambda i: (i, 0))

    def const_spec(arr):                     # VMEM-resident across batch steps
        return pl.BlockSpec(arr.shape, lambda i: (0, 0))

    out_padded = pl.pallas_call(
        _critic_kernel,
        out_shape=jax.ShapeDtypeStruct((b_pad, OUT_PAD), jnp.float32),
        grid=grid,
        in_specs=[
            batch_spec(state_dim),
            batch_spec(action_dim),
            const_spec(packed["w1_s"]), const_spec(packed["w1_a"]), const_spec(packed["b1"]),
            const_spec(packed["w2"]), const_spec(packed["b2"]),
            const_spec(packed["w3"]), const_spec(packed["b3"]),
        ],
        out_specs=pl.BlockSpec((tb, OUT_PAD), lambda i: (i, 0)),
        compiler_params=pltpu.CompilerParams(
            dimension_semantics=("parallel",),
            vmem_limit_bytes=32 * 1024 * 1024,
        ),
    )(state, action,
      packed["w1_s"], packed["w1_a"], packed["b1"],
      packed["w2"], packed["b2"],
      packed["w3"], packed["b3"])

    return out_padded[:B, :OUT]


def init_critic_params(key, state_dim, action_dim):
    """Deterministic init mimicking PyTorch nn.Linear default (U[-1/sqrt(fan_in), ...])."""
    in_dim = state_dim + action_dim
    dims = [(in_dim, HIDDEN1), (HIDDEN1, HIDDEN2), (HIDDEN2, OUT)]
    params = {}
    keys = jax.random.split(key, 2 * len(dims))
    for i, (fan_in, fan_out) in enumerate(dims):
        bound = 1.0 / jnp.sqrt(jnp.float32(fan_in))
        w = jax.random.uniform(keys[2 * i], (fan_in, fan_out), jnp.float32, -bound, bound)
        b = jax.random.uniform(keys[2 * i + 1], (1, fan_out), jnp.float32, -bound, bound)
        params[f"w{i + 1}"] = w
        params[f"b{i + 1}"] = b
    return params


def critic_forward_ref(state, action, params):
    """Pure-JAX f32 reference for correctness checking."""
    x = jnp.concatenate([state, action], axis=1).astype(jnp.float32)
    h1 = jnp.maximum(x @ params["w1"] + params["b1"], 0.0)
    h2 = jnp.maximum(h1 @ params["w2"] + params["b2"], 0.0)
    return h2 @ params["w3"] + params["b3"]


if __name__ == "__main__":
    state_dim, action_dim, batch = 16, 4, 8

    key = jax.random.PRNGKey(0)
    k_params, k_state, k_action = jax.random.split(key, 3)

    params = init_critic_params(k_params, state_dim, action_dim)
    packed = pack_critic_params(params, state_dim, action_dim)

    state = jax.random.normal(k_state, (batch, state_dim), jnp.float32)
    action = jax.random.normal(k_action, (batch, action_dim), jnp.float32)

    out = critic_forward(state, action, packed)
    out = jax.block_until_ready(out)

    ref = critic_forward_ref(state, action, params)
    assert out.shape == (batch, 1)
    assert bool(jnp.all(jnp.isfinite(out)))
    # bf16 operands / f32 accumulation vs. pure-f32 reference -> loose tolerance.
    assert jnp.allclose(out, ref, atol=5e-2, rtol=5e-2)

    print("KERNEL_OK")
</pallas_src>

<mosaic_0001>
module attributes {stable_mosaic.version = 11 : i64} {
  func.func @_critic_kernel(%arg0: i32, %arg1: memref<8x16xbf16, #tpu.memory_space<vmem>>, %arg2: memref<8x4xbf16, #tpu.memory_space<vmem>>, %arg3: memref<16x512xbf16, #tpu.memory_space<vmem>>, %arg4: memref<4x512xbf16, #tpu.memory_space<vmem>>, %arg5: memref<1x512xf32, #tpu.memory_space<vmem>>, %arg6: memref<512x384xbf16, #tpu.memory_space<vmem>>, %arg7: memref<1x384xf32, #tpu.memory_space<vmem>>, %arg8: memref<384x128xbf16, #tpu.memory_space<vmem>>, %arg9: memref<1x128xf32, #tpu.memory_space<vmem>>, %arg10: memref<8x128xf32, #tpu.memory_space<vmem>>) attributes {dimension_semantics = [#tpu.dimension_semantics<parallel>], iteration_bounds = array<i64: 1>, scalar_prefetch = 0 : i64, scratch_operands = 0 : i64, tpu.core_type = #tpu.core_type<tc>, window_params = [{transform_indices = @transform_0, window_bounds = array<i64: 8, 16>}, {transform_indices = @transform_1, window_bounds = array<i64: 8, 4>}, {pipeline_mode = #tpu.pipeline_mode<synchronous>, transform_indices = @transform_2, window_bounds = array<i64: 16, 512>}, {pipeline_mode = #tpu.pipeline_mode<synchronous>, transform_indices = @transform_3, window_bounds = array<i64: 4, 512>}, {pipeline_mode = #tpu.pipeline_mode<synchronous>, transform_indices = @transform_4, window_bounds = array<i64: 1, 512>}, {pipeline_mode = #tpu.pipeline_mode<synchronous>, transform_indices = @transform_5, window_bounds = array<i64: 512, 384>}, {pipeline_mode = #tpu.pipeline_mode<synchronous>, transform_indices = @transform_6, window_bounds = array<i64: 1, 384>}, {pipeline_mode = #tpu.pipeline_mode<synchronous>, transform_indices = @transform_7, window_bounds = array<i64: 384, 128>}, {pipeline_mode = #tpu.pipeline_mode<synchronous>, transform_indices = @transform_8, window_bounds = array<i64: 1, 128>}, {transform_indices = @transform_9, window_bounds = array<i64: 8, 128>}]} {
    %c0 = arith.constant 0 : index
    %c0_0 = arith.constant 0 : index
    %0 = vector.load %arg1[%c0, %c0_0] : memref<8x16xbf16, #tpu.memory_space<vmem>>, vector<8x16xbf16>
    %c0_1 = arith.constant 0 : index
    %c0_2 = arith.constant 0 : index
    %1 = vector.load %arg3[%c0_1, %c0_2] : memref<16x512xbf16, #tpu.memory_space<vmem>>, vector<16x512xbf16>
    %cst = arith.constant dense<0.000000e+00> : vector<8x512xf32>
    %2 = tpu.matmul %0, %1, %cst {dimension_numbers = #tpu.dot_dimension_numbers<[1], [0], [0], [1], [0, 0, 1, 1], [], []>} : vector<8x16xbf16>, vector<16x512xbf16>, vector<8x512xf32> -> vector<8x512xf32>
    %c0_3 = arith.constant 0 : index
    %c0_4 = arith.constant 0 : index
    %3 = vector.load %arg2[%c0_3, %c0_4] : memref<8x4xbf16, #tpu.memory_space<vmem>>, vector<8x4xbf16>
    %c0_5 = arith.constant 0 : index
    %c0_6 = arith.constant 0 : index
    %4 = vector.load %arg4[%c0_5, %c0_6] : memref<4x512xbf16, #tpu.memory_space<vmem>>, vector<4x512xbf16>
    %cst_7 = arith.constant dense<0.000000e+00> : vector<8x512xf32>
    %5 = tpu.matmul %3, %4, %cst_7 {dimension_numbers = #tpu.dot_dimension_numbers<[1], [0], [0], [1], [0, 0, 1, 1], [], []>} : vector<8x4xbf16>, vector<4x512xbf16>, vector<8x512xf32> -> vector<8x512xf32>
    %6 = arith.addf %2, %5 : vector<8x512xf32>
    %c0_8 = arith.constant 0 : index
    %c0_9 = arith.constant 0 : index
    %7 = vector.load %arg5[%c0_8, %c0_9] : memref<1x512xf32, #tpu.memory_space<vmem>>, vector<1x512xf32>
    %8 = vector.broadcast %7 : vector<1x512xf32> to vector<8x512xf32>
    %9 = arith.addf %6, %8 : vector<8x512xf32>
    %cst_10 = arith.constant 0.000000e+00 : f32
    %10 = vector.broadcast %cst_10 : f32 to vector<8x512xf32>
    %11 = arith.maximumf %9, %10 : vector<8x512xf32>
    %12 = arith.truncf %11 : vector<8x512xf32> to vector<8x512xbf16>
    %c0_11 = arith.constant 0 : index
    %c0_12 = arith.constant 0 : index
    %13 = vector.load %arg6[%c0_11, %c0_12] : memref<512x384xbf16, #tpu.memory_space<vmem>>, vector<512x384xbf16>
    %cst_13 = arith.constant dense<0.000000e+00> : vector<8x384xf32>
    %14 = tpu.matmul %12, %13, %cst_13 {dimension_numbers = #tpu.dot_dimension_numbers<[1], [0], [0], [1], [0, 0, 1, 1], [], []>} : vector<8x512xbf16>, vector<512x384xbf16>, vector<8x384xf32> -> vector<8x384xf32>
    %c0_14 = arith.constant 0 : index
    %c0_15 = arith.constant 0 : index
    %15 = vector.load %arg7[%c0_14, %c0_15] : memref<1x384xf32, #tpu.memory_space<vmem>>, vector<1x384xf32>
    %16 = vector.broadcast %15 : vector<1x384xf32> to vector<8x384xf32>
    %17 = arith.addf %14, %16 : vector<8x384xf32>
    %cst_16 = arith.constant 0.000000e+00 : f32
    %18 = vector.broadcast %cst_16 : f32 to vector<8x384xf32>
    %19 = arith.maximumf %17, %18 : vector<8x384xf32>
    %20 = arith.truncf %19 : vector<8x384xf32> to vector<8x384xbf16>
    %c0_17 = arith.constant 0 : index
    %c0_18 = arith.constant 0 : index
    %21 = vector.load %arg8[%c0_17, %c0_18] : memref<384x128xbf16, #tpu.memory_space<vmem>>, vector<384x128xbf16>
    %cst_19 = arith.constant dense<0.000000e+00> : vector<8x128xf32>
    %22 = tpu.matmul %20, %21, %cst_19 {dimension_numbers = #tpu.dot_dimension_numbers<[1], [0], [0], [1], [0, 0, 1, 1], [], []>} : vector<8x384xbf16>, vector<384x128xbf16>, vector<8x128xf32> -> vector<8x128xf32>
    %c0_20 = arith.constant 0 : index
    %c0_21 = arith.constant 0 : index
    %23 = vector.load %arg9[%c0_20, %c0_21] : memref<1x128xf32, #tpu.memory_space<vmem>>, vector<1x128xf32>
    %24 = vector.broadcast %23 : vector<1x128xf32> to vector<8x128xf32>
    %25 = arith.addf %22, %24 : vector<8x128xf32>
    %c0_22 = arith.constant 0 : index
    %c0_23 = arith.constant 0 : index
    %26 = vector.load %arg10[%c0_22, %c0_23] : memref<8x128xf32, #tpu.memory_space<vmem>>, vector<8x128xf32>
    tpu.vector_store %arg10[%c0_22, %c0_23], %25 {strides = array<i32>} : memref<8x128xf32, #tpu.memory_space<vmem>>, vector<8x128xf32>,
    return
  }
  func.func @transform_0(%arg0: i32) -> (i32, i32) {
    %c0_i32 = arith.constant 0 : i32
    %c0_i32_0 = arith.constant 0 : i32
    return %arg0, %c0_i32 : i32, i32
  }
  func.func @transform_1(%arg0: i32) -> (i32, i32) {
    %c0_i32 = arith.constant 0 : i32
    %c0_i32_0 = arith.constant 0 : i32
    return %arg0, %c0_i32 : i32, i32
  }
  func.func @transform_2(%arg0: i32) -> (i32, i32) {
    %c0_i32 = arith.constant 0 : i32
    %c0_i32_0 = arith.constant 0 : i32
    %c0_i32_1 = arith.constant 0 : i32
    return %c0_i32, %c0_i32_0 : i32, i32
  }
  func.func @transform_3(%arg0: i32) -> (i32, i32) {
    %c0_i32 = arith.constant 0 : i32
    %c0_i32_0 = arith.constant 0 : i32
    %c0_i32_1 = arith.constant 0 : i32
    return %c0_i32, %c0_i32_0 : i32, i32
  }
  func.func @transform_4(%arg0: i32) -> (i32, i32) {
    %c0_i32 = arith.constant 0 : i32
    %c0_i32_0 = arith.constant 0 : i32
    %c0_i32_1 = arith.constant 0 : i32
    return %c0_i32, %c0_i32_0 : i32, i32
  }
  func.func @transform_5(%arg0: i32) -> (i32, i32) {
    %c0_i32 = arith.constant 0 : i32
    %c0_i32_0 = arith.constant 0 : i32
    %c0_i32_1 = arith.constant 0 : i32
    return %c0_i32, %c0_i32_0 : i32, i32
  }
  func.func @transform_6(%arg0: i32) -> (i32, i32) {
    %c0_i32 = arith.constant 0 : i32
    %c0_i32_0 = arith.constant 0 : i32
    %c0_i32_1 = arith.constant 0 : i32
    return %c0_i32, %c0_i32_0 : i32, i32
  }
  func.func @transform_7(%arg0: i32) -> (i32, i32) {
    %c0_i32 = arith.constant 0 : i32
    %c0_i32_0 = arith.constant 0 : i32
    %c0_i32_1 = arith.constant 0 : i32
    return %c0_i32, %c0_i32_0 : i32, i32
  }
  func.func @transform_8(%arg0: i32) -> (i32, i32) {
    %c0_i32 = arith.constant 0 : i32
    %c0_i32_0 = arith.constant 0 : i32
    %c0_i32_1 = arith.constant 0 : i32
    return %c0_i32, %c0_i32_0 : i32, i32
  }
  func.func @transform_9(%arg0: i32) -> (i32, i32) {
    %c0_i32 = arith.constant 0 : i32
    %c0_i32_0 = arith.constant 0 : i32
    return %arg0, %c0_i32 : i32, i32
  }
}

</mosaic_0001>

<bundles_post_ra>
// kernel: tpu_custom_call.1
= control target key start
LH: loop header
LB: loop body
LE: loop exit
PB: predicated region body
PF: predicated region fallthrough
CT: control target
= control target key end

     0   :  { %14 = vsyncpa [#allocation3], 0  ;;  %s2121_s0 = inlined_call_operand.vmem [shape: bf16[8,16], index: 0, kind: input, shape index: {}]   ;;  %s2122_s1 = inlined_call_operand.vmem [shape: bf16[8,4], index: 1, kind: input, shape index: {}]   ;;  %s2123_s2 = inlined_call_operand.hbm [shape: bf16[16,512], index: 2, kind: input, shape index: {}]   ;;  %s2124_s3 = inlined_call_operand.vmem [shape: bf16[4,512], index: 3, kind: input, shape index: {}]   ;;  %s2125_s4 = inlined_call_operand.vmem [shape: f32[1,512], index: 4, kind: input, shape index: {}]   ;;  %s2126_s5 = inlined_call_operand.hbm [shape: bf16[512,384], index: 5, kind: input, shape index: {}]   ;;  %s2127_s6 = inlined_call_operand.vmem [shape: f32[1,384], index: 6, kind: input, shape index: {}]   ;;  %s2128_s7 = inlined_call_operand.hbm [shape: bf16[384,128], index: 7, kind: input, shape index: {}]   ;;  %s2129_s8 = inlined_call_operand.vmem [shape: f32[1,128], index: 8, kind: input, shape index: {}]   ;;  %s2130_s9 = inlined_call_operand.hbm [shape: f32[8,128], index: 9, kind: output, shape index: {}]  }
   0x1   :  { %15 = vsyncpa [#allocation6], 0 }
   0x2   :  { %16 = vsyncpa [#allocation4], 0  ;;  %s1959_s30 = smov [#allocation5]   ;;  %s1865_s13 = scalar_lea.hbm %s2126_s5, 12288 }
   0x3   :  { %s42_s10 = sshll.u32 %s1959_s30, 4  ;;  %p1866_p0 = scmp.ne.s32.totalorder %s2126_s5, %s1865_s13  ;;  %s43_s10 = int_to_ptr.vmem [resolvable:$true] %s42_s10 }
   0x4   :  { %p1869_p1 = scmp.lt.u32.totalorder %s1865_s13, %s2126_s5 }
   0x6   :  { %p1871_p2 = pnand %p1869_p1, %p1866_p0 }
   0x8   :  { %1874 = shalt.err (!%p1871_p2)
}
   0x9   :  { %s1875_s18 = scalar_lea.vmem %s43_s10, 12288  ;;  %p1880_p4 = scmp.lt.s32.totalorder %s43_s10, %s43_s10 }
   0xa   :  { %p1876_p3 = scmp.ne.s32.totalorder %s43_s10, %s1875_s18  ;;  %p1881_p5 = scmp.lt.s32.totalorder %s1875_s18, %s1875_s18 }
   0xc   :  { %p1882_p6 = por %p1881_p5, %p1880_p4 }
   0xe   :  { %p1883_p7 = pnand %p1882_p6, %p1876_p3 }
  0x10   :  { %1886 = shalt.err (!%p1883_p7)
}
  0x11   :  { %s1960_s19 = smov 192   ;;  %s1961_s20 = smov 12  }
  0x12   :  { %48 = dma.hbm_to_vmem [thread:$0]  %s2126_s5, 12288, %s43_s10, [#allocation6], %s1960_s19, %s1960_s19, %s1961_s20  }
  0x13   :  { %s1962_s23 = smov [#allocation2]   ;;  %s1887_s27 = scalar_lea.hbm %s2123_s2, 512 }
  0x14   :  { %s26_s24 = sshll.u32 %s1962_s23, 4  ;;  %p1888_p8 = scmp.ne.s32.totalorder %s2123_s2, %s1887_s27  ;;  %s27_s24 = int_to_ptr.vmem [resolvable:$true] %s26_s24 }
  0x15   :  { %p1891_p9 = scmp.lt.u32.totalorder %s1887_s27, %s2123_s2 }
  0x17   :  { %p1893_p10 = pnand %p1891_p9, %p1888_p8 }
  0x19   :  { %1896 = shalt.err (!%p1893_p10)
}
  0x1a   :  { %s1897_s12 = scalar_lea.vmem %s27_s24, 512  ;;  %p1902_p12 = scmp.lt.s32.totalorder %s27_s24, %s27_s24 }
  0x1b   :  { %p1898_p11 = scmp.ne.s32.totalorder %s27_s24, %s1897_s12  ;;  %p1903_p13 = scmp.lt.s32.totalorder %s1897_s12, %s1897_s12 }
  0x1d   :  { %p1904_p0 = por %p1903_p13, %p1902_p12 }
  0x1f   :  { %p1905_p1 = pnand %p1904_p0, %p1898_p11 }
  0x21   :  { %1908 = shalt.err (!%p1905_p1)
}
  0x22   :  { %s1963_s5 = smov 256   ;;  %s1964_s10 = smov 16  }
  0x23   :  { %32 = dma.hbm_to_vmem [thread:$0]  %s2123_s2, 512, %s27_s24, [#allocation3], %s1963_s5, %s1963_s5, %s1964_s10  }
  0x24   :  { %s1965_s15 = smov [#allocation7]   ;;  %s1909_s19 = scalar_lea.hbm %s2128_s7, 3072 }
  0x25   :  { %s56_s16 = sshll.u32 %s1965_s15, 4  ;;  %p1910_p2 = scmp.ne.s32.totalorder %s2128_s7, %s1909_s19  ;;  %s57_s16 = int_to_ptr.vmem [resolvable:$true] %s56_s16 }
  0x26   :  { %p1913_p3 = scmp.lt.u32.totalorder %s1909_s19, %s2128_s7 }
  0x28   :  { %p1915_p4 = pnand %p1913_p3, %p1910_p2 }
  0x2a   :  { %1918 = shalt.err (!%p1915_p4)
}
  0x2b   :  { %s1919_s25 = scalar_lea.vmem %s57_s16, 3072  ;;  %p1924_p6 = scmp.lt.s32.totalorder %s57_s16, %s57_s16 }
  0x2c   :  { %p1920_p5 = scmp.ne.s32.totalorder %s57_s16, %s1919_s25  ;;  %p1925_p7 = scmp.lt.s32.totalorder %s1919_s25, %s1919_s25 }
  0x2e   :  { %p1926_p8 = por %p1925_p7, %p1924_p6 }
  0x30   :  { %p1927_p9 = pnand %p1926_p8, %p1920_p5 }
  0x32   :  { %1930 = shalt.err (!%p1927_p9)
}
  0x33   :  { %s1966_s2 = smov 64   ;;  %s1967_s24 = smov 4  }
  0x34   :  { %62 = dma.hbm_to_vmem [thread:$0]  %s2128_s7, 3072, %s57_s16, [#allocation6], %s1966_s2, %s1966_s2, %s1967_s24  }
  0x35   :  { %1953 = dma.done.wait [#allocation3], 512  }
  0x36   :  { %1954 = vsyncadd [#allocation3], 4294966784 }
  0x37   :  { %1955 = dma.done.wait [#allocation6], 15360  }
  0x38   :  { %1956 = vsyncadd [#allocation6], 4294951936  ;;  %v87_v0 = vlaneseq  ;;  %v1968_v1 = vmov 1983009808   ;;  %v1969_v3 = vmov 0   ;;  %v81_v7 = vld [vmem:[%s2124_s3] sm:$0xff] }
  0x39   :  { %v85_v2 = vunpack.c.l.s4 %v1968_v1  ;;  %149 = vmatprep.mubr.bf16.mxu0 %v1969_v3  ;;  %190 = vmatprep.mubr.bf16.mxu1 %v1969_v3  ;;  %vm104_vm0 = vcmask 1041408   ;;  %v83_v9 = vcombine.high %v81_v7, %v81_v7  ;;  %v1708_v12 = vld [vmem:[#allocation2 + $0x4] ss:$16 sps:$4 sm:$0xff]   ;;  %v80_v14 = vld [vmem:[%s2122_s1] sm:$0xf]  ;;  %vm100_vm1 = vcmask 31744  }
  0x3a   :  { %v2059_v4 = vshrl.u32 %v87_v0, 7  ;;  %v1712_v17 = vld [vmem:[#allocation2 + $0xc] ss:$16 sps:$4 sm:$0xff]   ;;  %v1706_v18 = vld [vmem:[#allocation2] ss:$16 sps:$4 sm:$0xff]   ;;  %vm219_vm2 = vcmask 130048  }
  0x3b   :  { %v86_v5 = vunpack.c.0.s8 %v85_v2  ;;  %v1715_v19 = vld [vmem:[#allocation5 + $0x4] ss:$12 sps:$4 sm:$0xff]   ;;  %v1710_v20 = vld [vmem:[#allocation2 + $0x8] ss:$16 sps:$4 sm:$0xff]   ;;  %v75_v21 = vld [vmem:[%s2121_s0] sm:$0xf] }
  0x3c   :  { %v1713_v22 = vld [vmem:[#allocation5] ss:$12 sps:$4 sm:$0xff]   ;;  %v1718_v23 = vld [vmem:[#allocation5 + $0x1c] ss:$12 sps:$4 sm:$0xff]   ;;  %v1716_v26 = vld [vmem:[#allocation5 + $0x18] ss:$12 sps:$4 sm:$0xff]  }
  0x3d   :  { %v89_v6 = vsub.s32 %v86_v5, %v2059_v4  ;;  %v1740_v24 = vld [vmem:[#allocation5 + $0xc8] ss:$12 sps:$4 sm:$0xff]   ;;  %v1745_v28 = vld [vmem:[#allocation5 + $0xe0] ss:$12 sps:$4 sm:$0xff]   ;;  %v1719_v30 = vld [vmem:[#allocation5 + $0x30] ss:$12 sps:$4 sm:$0xff]  }
  0x3e   :  { %v1741_v25 = vld [vmem:[#allocation5 + $0x8] ss:$12 sps:$4 sm:$0xff]   ;;  %v1746_v29 = vld [vmem:[#allocation5 + $0x20] ss:$12 sps:$4 sm:$0xff]   ;;  %v1750_v32 = vld [vmem:[#allocation5 + $0xf8] ss:$12 sps:$4 sm:$0xff]  }
  0x3f   :  { %v90_v8 = vrot.slane %v81_v7, %v89_v6  ;;  %v97_v13 = vrot.slane %v83_v9, %v89_v6  ;;  %v1721_v27 = vld [vmem:[#allocation5 + $0x34] ss:$12 sps:$4 sm:$0xff]   ;;  %v1724_v31 = vld [vmem:[#allocation5 + $0x4c] ss:$12 sps:$4 sm:$0xff]   ;;  %v1727_v35 = vld [vmem:[#allocation5 + $0x64] ss:$12 sps:$4 sm:$0xff]  }
  0x40   :  { %v1751_v33 = vld [vmem:[#allocation5 + $0x38] ss:$12 sps:$4 sm:$0xff]   ;;  %v1722_v34 = vld [vmem:[#allocation5 + $0x48] ss:$12 sps:$4 sm:$0xff]   ;;  %v1755_v36 = vld [vmem:[#allocation5 + $0x110] ss:$12 sps:$4 sm:$0xff]  }
  0x41   :  { %v98_v10 = vcombine.high %v90_v8, %v90_v8  ;;  %v106_v11 = vsel %vm104_vm0, %v90_v8, 0  ;;  %v99_v15 = vcombine.high %v97_v13, %v97_v13  ;;  %v112_v16 = vsel %vm104_vm0, %v97_v13, 0  ;;  %v1756_v37 = vld [vmem:[#allocation5 + $0x50] ss:$12 sps:$4 sm:$0xff]   ;;  %v1725_v38 = vld [vmem:[#allocation5 + $0x60] ss:$12 sps:$4 sm:$0xff]  }
  0x42   :  { %v1730_v39 = vld [vmem:[#allocation5 + $0x7c] ss:$12 sps:$4 sm:$0xff]   ;;  %v1728_v40 = vld [vmem:[#allocation5 + $0x78] ss:$12 sps:$4 sm:$0xff]   ;;  %v1733_v41 = vld [vmem:[#allocation5 + $0x94] ss:$12 sps:$4 sm:$0xff]  }
  0x43   :  { %1460 = vmatprep.subr.msk.bf16.mxu0 %vm104_vm0, %v98_v10  ;;  %1462 = vmatprep.subr.msk.bf16.mxu1 %vm104_vm0, %v99_v15  ;;  %v1731_v42 = vld [vmem:[#allocation5 + $0x90] ss:$12 sps:$4 sm:$0xff]   ;;  %v1736_v43 = vld [vmem:[#allocation5 + $0xac] ss:$12 sps:$4 sm:$0xff]   ;;  %v1734_v44 = vld [vmem:[#allocation5 + $0xa8] ss:$12 sps:$4 sm:$0xff]  }
  0x44   :  { %118 = vmatpush1.bf16.msra.mxu0 %v106_v11  ;;  %159 = vmatpush1.bf16.msra.mxu1 %v112_v16  ;;  %v1739_v45 = vld [vmem:[#allocation5 + $0xc4] ss:$12 sps:$4 sm:$0xff]   ;;  %v1737_v46 = vld [vmem:[#allocation5 + $0xc0] ss:$12 sps:$4 sm:$0xff]   ;;  %v1744_v47 = vld [vmem:[#allocation5 + $0xdc] ss:$12 sps:$4 sm:$0xff]  }
  0x45   :  { %223 = vmatprep.subr.bf16.mxu0 %v1708_v12  ;;  %264 = vmatprep.subr.bf16.mxu1 %v1712_v17  ;;  %v1742_v48 = vld [vmem:[#allocation5 + $0xd8] ss:$12 sps:$4 sm:$0xff]   ;;  %v1749_v49 = vld [vmem:[#allocation5 + $0xf4] ss:$12 sps:$4 sm:$0xff]   ;;  %v1747_v50 = vld [vmem:[#allocation5 + $0xf0] ss:$12 sps:$4 sm:$0xff]  }
  0x46   :  { %v1754_v51 = vld [vmem:[#allocation5 + $0x10c] ss:$12 sps:$4 sm:$0xff]   ;;  %v1752_v52 = vld [vmem:[#allocation5 + $0x108] ss:$12 sps:$4 sm:$0xff]   ;;  %v1759_v53 = vld [vmem:[#allocation5 + $0x124] ss:$12 sps:$4 sm:$0xff]  }
  0x47   :  { %1461 = vmatmul.mubr.msk.bf16.vlgmr.msra.gmra.mrb[0].mxu0 %vm100_vm1, %v80_v14  ;;  %1463 = vmatmul.mubr.msk.bf16.vlgmr.msra.gmra.mrb[0].mxu1 %vm100_vm1, %v80_v14  ;;  %v1760_v54 = vld [vmem:[#allocation5 + $0x128] ss:$12 sps:$4 sm:$0xff]   ;;  %v1757_v55 = vld [vmem:[#allocation5 + $0x120] ss:$12 sps:$4 sm:$0xff]   ;;  %v1762_v57 = vld [vmem:[#allocation5 + $0x138] ss:$12 sps:$4 sm:$0xff]  }
  0x48   :  { %224 = vmatpush1.bf16.msra.mxu0 %v1706_v18  ;;  %255 = vmatprep.mubr.bf16.mxu0 %v1969_v3  ;;  %v1761_v56 = vld [vmem:[#allocation5 + $0x68] ss:$12 sps:$4 sm:$0xff]   ;;  %v1765_v59 = vld [vmem:[#allocation5 + $0x140] ss:$12 sps:$4 sm:$0xff]   ;;  %v1767_v62 = vld [vmem:[#allocation5 + $0x150] ss:$12 sps:$4 sm:$0xff]  }
  0x49   :  { %996 = vmatprep.subr.bf16.mxu0 %v1715_v19  ;;  %265 = vmatpush1.bf16.msra.mxu1 %v1710_v20  ;;  %v1764_v58 = vld [vmem:[#allocation5 + $0x13c] ss:$12 sps:$4 sm:$0xff]   ;;  %v1766_v60 = vld [vmem:[#allocation5 + $0x80] ss:$12 sps:$4 sm:$0xff]   ;;  %v1770_v63 = vld [vmem:[#allocation5 + $0x158] ss:$12 sps:$4 sm:$0xff]  }
  0x4a   :  { %296 = vmatprep.mubr.bf16.mxu1 %v1969_v3  ;;  %1591 = vmatprep.subr.bf16.mxu1 %v1740_v24  ;;  %v1769_v61 = vld [vmem:[#allocation5 + $0x154] ss:$12 sps:$4 sm:$0xff]   ;;  %v1771_v0 = vld [vmem:[#allocation5 + $0x98] ss:$12 sps:$4 sm:$0xff]   ;;  %v1775_v2 = vld [vmem:[#allocation5 + $0x170] ss:$12 sps:$4 sm:$0xff]  }
  0x4b   :  { %v1774_v1 = vld [vmem:[#allocation5 + $0x16c] ss:$12 sps:$4 sm:$0xff]   ;;  %v1772_v3 = vld [vmem:[#allocation5 + $0x168] ss:$12 sps:$4 sm:$0xff]   ;;  %v1776_v5 = vld [vmem:[#allocation5 + $0xb0] ss:$12 sps:$4 sm:$0xff]  }
  0x4c   :  { %v1779_v6 = vld [vmem:[#allocation5 + $0x184] ss:$12 sps:$4 sm:$0xff]   ;;  %v1780_v7 = vld [vmem:[#allocation5 + $0x248] ss:$12 sps:$4 sm:$0xff]   ;;  %v309_v13 = vsub.s32 0, %v2059_v4  ;;  %v313_v16 = vsub.s32 1, %v2059_v4 }
  0x4d   :  { %v2079_v15 = vld [vmem:[%s2125_s4] sm:$0xf]  ;;  %v321_v19 = vsub.s32 3, %v2059_v4  ;;  %vm1971_vm3 = vmmov 0   ;;  %s1972_s10 = smov [#allocation8]  }
  0x4e   :  { %v310_v20 = vrot.slane %v2079_v15, %v309_v13  ;;  %s1450_s13 = sshll.u32 %s1972_s10, 4  ;;  %s1451_s13 = int_to_ptr.vmem [resolvable:$true] %s1450_s13 }
  0x4f   :  { %1468 = vmatmul.mubr.msk.bf16.vlgmr.msra.gmra.mrb[4].mxu0 %vm219_vm2, %v75_v21  ;;  %1469 = vmatmul.mubr.msk.bf16.vlgmr.msra.gmra.mrb[4].mxu1 %vm219_vm2, %v75_v21  ;;  %s1931_s14 = scalar_lea.vmem %s1451_s13, 128  ;;  %p1936_p11 = scmp.lt.s32.totalorder %s1451_s13, %s1451_s13 }
  0x50   :  { %997 = vmatpush1.bf16.msra.mxu0 %v1713_v22  ;;  %1592 = vmatpush3.bf16.msra.mxu1 %v1741_v25  ;;  %v314_v22 = vrot.slane %v2079_v15, %v313_v16  ;;  %p1932_p10 = scmp.ne.s32.totalorder %s1451_s13, %s1931_s14  ;;  %p1937_p12 = scmp.lt.s32.totalorder %s1931_s14, %s1931_s14 }
  0x51   :  { %998 = vmatprep.subr.bf16.mxu0 %v1718_v23  ;;  %1593 = vmatprep.subr.bf16.mxu1 %v1745_v28  ;;  %v322_v28 = vrot.slane %v2079_v15, %v321_v19  ;;  %v1817_v19 = vld [vmem:[#allocation5 + $0x240] ss:$12 sps:$4 sm:$0xff]  }
  0x52   :  { %p1938_p13 = por %p1937_p12, %p1936_p11 }
  0x54   :  { %999 = vmatpush1.bf16.msra.mxu0 %v1716_v26  ;;  %1594 = vmatpush3.bf16.msra.mxu1 %v1746_v29  ;;  %p1939_p0 = pnand %p1938_p13, %p1932_p10 }
  0x55   :  { %1000 = vmatprep.subr.bf16.mxu0 %v1721_v27  ;;  %1595 = vmatprep.subr.bf16.mxu1 %v1750_v32 }
  0x58   :  { %1001 = vmatpush1.bf16.msra.mxu0 %v1719_v30  ;;  %1596 = vmatpush3.bf16.msra.mxu1 %v1751_v33 }
  0x59   :  { %1002 = vmatprep.subr.bf16.mxu0 %v1724_v31  ;;  %1597 = vmatprep.subr.bf16.mxu1 %v1755_v36 }
  0x5c   :  { %1003 = vmatpush1.bf16.msra.mxu0 %v1722_v34  ;;  %1598 = vmatpush3.bf16.msra.mxu1 %v1756_v37 }
  0x5d   :  { %1004 = vmatprep.subr.bf16.mxu0 %v1727_v35  ;;  %1599 = vmatprep.subr.bf16.mxu1 %v1760_v54  ;;  %v1794_v54 = vld [vmem:[#allocation5 + $0x1cc] ss:$12 sps:$4 sm:$0xff]  }
  0x60   :  { %1005 = vmatpush1.bf16.msra.mxu0 %v1725_v38  ;;  %1600 = vmatpush3.bf16.msra.mxu1 %v1761_v56  ;;  %v1792_v56 = vld [vmem:[#allocation5 + $0x1c8] ss:$12 sps:$4 sm:$0xff]  }
  0x61   :  { %1006 = vmatprep.subr.bf16.mxu0 %v1730_v39  ;;  %1601 = vmatprep.subr.bf16.mxu1 %v1765_v59  ;;  %v1800_v59 = vld [vmem:[#allocation5 + $0x2a8] ss:$12 sps:$4 sm:$0xff]  }
  0x64   :  { %1007 = vmatpush1.bf16.msra.mxu0 %v1728_v40  ;;  %1602 = vmatpush3.bf16.msra.mxu1 %v1766_v60  ;;  %v317_v60 = vsub.s32 2, %v2059_v4  ;;  %v1859_v4 = vld [vmem:[#allocation7 + $0x90] sm:$0xff]  }
  0x65   :  { %1008 = vmatprep.subr.bf16.mxu0 %v1733_v41  ;;  %1603 = vmatprep.subr.bf16.mxu1 %v1770_v63  ;;  %v1777_v41 = vld [vmem:[#allocation5 + $0x180] ss:$12 sps:$4 sm:$0xff]   ;;  %v1804_v63 = vld [vmem:[#allocation5 + $0x1fc] ss:$12 sps:$4 sm:$0xff]  }
  0x68   :  { %1009 = vmatpush1.bf16.msra.mxu0 %v1731_v42  ;;  %1604 = vmatpush3.bf16.msra.mxu1 %v1771_v0  ;;  %v1781_v42 = vld [vmem:[#allocation5 + $0x188] ss:$12 sps:$4 sm:$0xff]   ;;  %v1805_v0 = vld [vmem:[#allocation5 + $0x2c0] ss:$12 sps:$4 sm:$0xff]  }
  0x69   :  { %1010 = vmatprep.subr.bf16.mxu0 %v1736_v43  ;;  %1605 = vmatprep.subr.bf16.mxu1 %v1775_v2  ;;  %v1802_v2 = vld [vmem:[#allocation5 + $0x1f8] ss:$12 sps:$4 sm:$0xff]  }
  0x6c   :  { %1011 = vmatpush1.bf16.msra.mxu0 %v1734_v44  ;;  %1606 = vmatpush3.bf16.msra.mxu1 %v1776_v5  ;;  %v1809_v5 = vld [vmem:[#allocation5 + $0x214] ss:$12 sps:$4 sm:$0xff]  }
  0x6d   :  { %1012 = vmatprep.subr.bf16.mxu0 %v1739_v45  ;;  %1613 = vmatprep.subr.bf16.mxu1 %v1780_v7  ;;  %v1784_v45 = vld [vmem:[#allocation5 + $0x19c] ss:$12 sps:$4 sm:$0xff]  }
  0x70   :  { %1013 = vmatpush1.bf16.msra.mxu0 %v1737_v46  ;;  %v1785_v46 = vld [vmem:[#allocation5 + $0x260] ss:$12 sps:$4 sm:$0xff]  }
  0x71   :  { %1014 = vmatprep.subr.bf16.mxu0 %v1744_v47 }
  0x74   :  { %1015 = vmatpush1.bf16.msra.mxu0 %v1742_v48  ;;  %v1782_v48 = vld [vmem:[#allocation5 + $0x198] ss:$12 sps:$4 sm:$0xff]  }
  0x75   :  { %1016 = vmatprep.subr.bf16.mxu0 %v1749_v49  ;;  %v1786_v49 = vld [vmem:[#allocation5 + $0x1a0] ss:$12 sps:$4 sm:$0xff]  }
  0x78   :  { %1017 = vmatpush1.bf16.msra.mxu0 %v1747_v50  ;;  %v1789_v50 = vld [vmem:[#allocation5 + $0x1b4] ss:$12 sps:$4 sm:$0xff]  }
  0x79   :  { %1018 = vmatprep.subr.bf16.mxu0 %v1754_v51  ;;  %v1790_v51 = vld [vmem:[#allocation5 + $0x278] ss:$12 sps:$4 sm:$0xff]  }
  0x7c   :  { %1019 = vmatpush1.bf16.msra.mxu0 %v1752_v52  ;;  %v1787_v52 = vld [vmem:[#allocation5 + $0x1b0] ss:$12 sps:$4 sm:$0xff]  }
  0x7d   :  { %1020 = vmatprep.subr.bf16.mxu0 %v1759_v53  ;;  %v1791_v53 = vld [vmem:[#allocation5 + $0x1b8] ss:$12 sps:$4 sm:$0xff]  }
  0x80   :  { %1021 = vmatpush1.bf16.msra.mxu0 %v1757_v55  ;;  %v1795_v55 = vld [vmem:[#allocation5 + $0x290] ss:$12 sps:$4 sm:$0xff]  }
  0x81   :  { %1022 = vmatprep.subr.bf16.mxu0 %v1764_v58  ;;  %v1799_v58 = vld [vmem:[#allocation5 + $0x1e4] ss:$12 sps:$4 sm:$0xff]  }
  0x84   :  { %1023 = vmatpush1.bf16.msra.mxu0 %v1762_v57  ;;  %v1796_v57 = vld [vmem:[#allocation5 + $0x1d0] ss:$12 sps:$4 sm:$0xff]  }
  0x85   :  { %1024 = vmatprep.subr.bf16.mxu0 %v1769_v61  ;;  %v1797_v61 = vld [vmem:[#allocation5 + $0x1e0] ss:$12 sps:$4 sm:$0xff]  }
  0x88   :  { %1025 = vmatpush1.bf16.msra.mxu0 %v1767_v62  ;;  %v1801_v62 = vld [vmem:[#allocation5 + $0x1e8] ss:$12 sps:$4 sm:$0xff]  }
  0x89   :  { %1026 = vmatprep.subr.bf16.mxu0 %v1774_v1  ;;  %v318_v1 = vrot.slane %v2079_v15, %v317_v60  ;;  %v1816_v15 = vld [vmem:[#allocation5 + $0x230] ss:$12 sps:$4 sm:$0xff]  }
  0x8c   :  { %1027 = vmatpush1.bf16.msra.mxu0 %v1772_v3  ;;  %v1806_v3 = vld [vmem:[#allocation5 + $0x200] ss:$12 sps:$4 sm:$0xff]  }
  0x8d   :  { %1037 = vmatprep.subr.bf16.mxu0 %v1779_v6  ;;  %v1810_v6 = vld [vmem:[#allocation5 + $0x2d8] ss:$12 sps:$4 sm:$0xff]  }
 0x11a   :  { %v151_v8 = vpop.f32.mrb[0].mxu0  ;;  %v192_v11 = vpop.f32.mrb[0].mxu1 }
 0x11b   :  { %v153_v9 = vpop.f32.mrb[1].mxu0  ;;  %v194_v14 = vpop.f32.mrb[1].mxu1 }
 0x11c   :  { %v155_v10 = vpop.f32.mrb[2].mxu0  ;;  %v196_v17 = vpop.f32.mrb[2].mxu1 }
 0x11d   :  { %v156_v12 = vpop.f32.mrb[3].mxu0  ;;  %v197_v18 = vpop.f32.mrb[3].mxu1  ;;  %v1814_v10 = vld [vmem:[#allocation5 + $0x22c] ss:$12 sps:$4 sm:$0xff]   ;;  %v1819_v17 = vld [vmem:[#allocation5 + $0x244] ss:$12 sps:$4 sm:$0xff]  }
 0x122   :  { %v257_v21 = vpop.f32.mrb[4].mxu0  ;;  %v298_v27 = vpop.f32.mrb[4].mxu1 }
 0x123   :  { %v258_v23 = vadd.f32 %v257_v21, %v151_v8  ;;  %v259_v24 = vpop.f32.mrb[5].mxu0  ;;  %v2090_v31 = vadd.f32 %v298_v27, %v192_v11  ;;  %v300_v32 = vpop.f32.mrb[5].mxu1  ;;  %v1807_v8 = vld [vmem:[#allocation5 + $0x210] ss:$12 sps:$4 sm:$0xff]   ;;  %v1820_v21 = vld [vmem:[#allocation5 + $0x258] ss:$12 sps:$4 sm:$0xff]  }
 0x124   :  { %v260_v25 = vadd.f32 %v259_v24, %v153_v9  ;;  %v261_v26 = vpop.f32.mrb[6].mxu0  ;;  %v301_v34 = vadd.f32 %v300_v32, %v194_v14  ;;  %v302_v35 = vpop.f32.mrb[6].mxu1  ;;  %v1811_v9 = vld [vmem:[#allocation5 + $0x218] ss:$12 sps:$4 sm:$0xff]   ;;  %v1815_v11 = vld [vmem:[#allocation5 + $0x2f0] ss:$12 sps:$4 sm:$0xff]  }
 0x125   :  { %v327_v29 = vadd.f32 %v310_v20, %v258_v23  ;;  %v262_v30 = vpop.f32.mrb[7].mxu0  ;;  %v303_v37 = vpop.f32.mrb[7].mxu1  ;;  %v329_v7 = vadd.f32 %v318_v1, %v2090_v31  ;;  %v1812_v14 = vld [vmem:[#allocation5 + $0x228] ss:$12 sps:$4 sm:$0xff]   ;;  %v1823_v23 = vld [vmem:[#allocation5 + $0x270] ss:$12 sps:$4 sm:$0xff]  }
 0x126   :  { %v328_v33 = vadd.f32 %v314_v22, %v260_v25  ;;  %v330_v39 = vadd.f32 %v322_v28, %v301_v34  ;;  %v1822_v20 = vld [vmem:[#allocation5 + $0x25c] ss:$12 sps:$4 sm:$0xff]   ;;  %v1825_v22 = vld [vmem:[#allocation5 + $0x274] ss:$12 sps:$4 sm:$0xff]   ;;  %v1828_v24 = vld [vmem:[#allocation5 + $0x28c] ss:$12 sps:$4 sm:$0xff]  }
 0x127   :  { %v331_v36 = vmax.f32 %v327_v29, 0.0  ;;  %v333_v12 = vmax.f32 %v329_v7, 0.0  ;;  %v1826_v25 = vld [vmem:[#allocation5 + $0x288] ss:$12 sps:$4 sm:$0xff]   ;;  %v1831_v26 = vld [vmem:[#allocation5 + $0x2a4] ss:$12 sps:$4 sm:$0xff]  }
 0x128   :  { %v332_v38 = vmax.f32 %v328_v33, 0.0  ;;  %v334_v43 = vmax.f32 %v330_v39, 0.0  ;;  %v1829_v27 = vld [vmem:[#allocation5 + $0x2a0] ss:$12 sps:$4 sm:$0xff]   ;;  %v1834_v28 = vld [vmem:[#allocation5 + $0x2bc] ss:$12 sps:$4 sm:$0xff]  }
 0x129   :  { %v335_v44 = vpack.c.bf16 %v331_v36, %v331_v36  ;;  %v337_v18 = vpack.c.bf16 %v333_v12, %v333_v12  ;;  %v1832_v29 = vld [vmem:[#allocation5 + $0x2b8] ss:$12 sps:$4 sm:$0xff]   ;;  %v1837_v30 = vld [vmem:[#allocation5 + $0x2d4] ss:$12 sps:$4 sm:$0xff]   ;;  %v1835_v31 = vld [vmem:[#allocation5 + $0x2d0] ss:$12 sps:$4 sm:$0xff]  }
 0x12a   :  { %v336_v40 = vpack.c.bf16 %v332_v38, %v332_v38  ;;  %v338_v47 = vpack.c.bf16 %v334_v43, %v334_v43  ;;  %v1840_v32 = vld [vmem:[#allocation5 + $0x2ec] ss:$12 sps:$4 sm:$0xff]   ;;  %v1838_v33 = vld [vmem:[#allocation5 + $0x2e8] ss:$12 sps:$4 sm:$0xff]   ;;  %v1841_v34 = vld [vmem:[#allocation7 + $0x40] sm:$0xff]  }
 0x12b   :  { %v1842_v35 = vld [vmem:[#allocation7] sm:$0xff]   ;;  %v1843_v36 = vld [vmem:[#allocation7 + $0x48] sm:$0xff]   ;;  %v1845_v38 = vld [vmem:[#allocation7 + $0x50] sm:$0xff]  }
 0x12c   :  { %1028 = vmatprep.mubr.bf16.mxu0 %v336_v40  ;;  %1110 = vmatprep.mubr.bf16.mxu1 %v336_v40  ;;  %v1844_v37 = vld [vmem:[#allocation7 + $0x8] sm:$0xff]   ;;  %v1846_v39 = vld [vmem:[#allocation7 + $0x10] sm:$0xff]   ;;  %v1847_v40 = vld [vmem:[#allocation7 + $0x58] sm:$0xff]  }
 0x12d   :  { %1029 = vmatmul.mubr.bf16.vlgmr.msra.gmra.mrb[8].mxu0 %v335_v44  ;;  %1111 = vmatmul.mubr.bf16.vlgmr.msra.gmra.mrb[8].mxu1 %v335_v44  ;;  %v1850_v43 = vld [vmem:[#allocation7 + $0x20] sm:$0xff]   ;;  %v1851_v44 = vld [vmem:[#allocation7 + $0x68] sm:$0xff]  }
 0x12e   :  { %1038 = vmatpush1.bf16.msra.mxu0 %v1777_v41  ;;  %1614 = vmatpush3.bf16.msra.mxu1 %v1781_v42  ;;  %v1848_v41 = vld [vmem:[#allocation7 + $0x18] sm:$0xff]   ;;  %v1849_v42 = vld [vmem:[#allocation7 + $0x60] sm:$0xff]  }
 0x12f   :  { %1039 = vmatprep.subr.bf16.mxu0 %v1784_v45  ;;  %1615 = vmatprep.subr.bf16.mxu1 %v1785_v46  ;;  %v1852_v45 = vld [vmem:[#allocation7 + $0x28] sm:$0xff]   ;;  %v1853_v46 = vld [vmem:[#allocation7 + $0x70] sm:$0xff]  }
 0x130   :  { %1150 = vmatprep.mubr.bf16.mxu1 %v338_v47  ;;  %1069 = vmatprep.mubr.bf16.mxu0 %v338_v47  ;;  %v1854_v47 = vld [vmem:[#allocation7 + $0x30] sm:$0xff]  }
 0x132   :  { %1040 = vmatpush1.bf16.msra.mxu0 %v1782_v48  ;;  %1616 = vmatpush3.bf16.msra.mxu1 %v1786_v49  ;;  %v1855_v48 = vld [vmem:[#allocation7 + $0x78] sm:$0xff]  }
 0x133   :  { %1041 = vmatprep.subr.bf16.mxu0 %v1789_v50  ;;  %1617 = vmatprep.subr.bf16.mxu1 %v1790_v51  ;;  %v1856_v49 = vld [vmem:[#allocation7 + $0x38] sm:$0xff]   ;;  %v1970_v50 = vmov 0.0  }
 0x136   :  { %1042 = vmatpush1.bf16.msra.mxu0 %v1787_v52  ;;  %1618 = vmatpush3.bf16.msra.mxu1 %v1791_v53 }
 0x137   :  { %1043 = vmatprep.subr.bf16.mxu0 %v1794_v54  ;;  %1619 = vmatprep.subr.bf16.mxu1 %v1795_v55 }
 0x13a   :  { %1044 = vmatpush1.bf16.msra.mxu0 %v1792_v56  ;;  %1620 = vmatpush3.bf16.msra.mxu1 %v1796_v57  ;;  %v467_v56 = vld [vmem:[%s2127_s6] sm:$0x7] }
 0x13b   :  { %1045 = vmatprep.subr.bf16.mxu0 %v1799_v58  ;;  %1621 = vmatprep.subr.bf16.mxu1 %v1800_v59  ;;  %v480_v57 = vrot.slane %v467_v56, %v317_v60 }
 0x13e   :  { %1046 = vmatpush1.bf16.msra.mxu0 %v1797_v61  ;;  %1622 = vmatpush3.bf16.msra.mxu1 %v1801_v62 }
 0x13f   :  { %1047 = vmatprep.subr.bf16.mxu0 %v1804_v63  ;;  %1623 = vmatprep.subr.bf16.mxu1 %v1805_v0 }
 0x142   :  { %1048 = vmatpush1.bf16.msra.mxu0 %v1802_v2  ;;  %1624 = vmatpush3.bf16.msra.mxu1 %v1806_v3  ;;  %v472_v2 = vrot.slane %v467_v56, %v309_v13  ;;  %v476_v3 = vrot.slane %v467_v56, %v313_v16  ;;  %v1860_v13 = vld [vmem:[#allocation7 + $0x98] sm:$0xff]   ;;  %v1861_v16 = vld [vmem:[#allocation7 + $0xa0] sm:$0xff]  }
 0x143   :  { %1049 = vmatprep.subr.bf16.mxu0 %v1809_v5  ;;  %1625 = vmatprep.subr.bf16.mxu1 %v1810_v6 }
 0x146   :  { %1050 = vmatpush1.bf16.msra.mxu0 %v1807_v8  ;;  %1626 = vmatpush3.bf16.msra.mxu1 %v1811_v9 }
 0x147   :  { %1051 = vmatprep.subr.bf16.mxu0 %v1814_v10  ;;  %1627 = vmatprep.subr.bf16.mxu1 %v1815_v11 }
 0x14a   :  { %1052 = vmatpush1.bf16.msra.mxu0 %v1812_v14  ;;  %1628 = vmatpush3.bf16.msra.mxu1 %v1816_v15  ;;  %v1857_v14 = vld [vmem:[#allocation7 + $0x80] sm:$0xff]  }
 0x14b   :  { %1053 = vmatprep.subr.bf16.mxu0 %v1819_v17  ;;  %1635 = vmatprep.subr.bf16.mxu1 %v1841_v34  ;;  %v1858_v17 = vld [vmem:[#allocation7 + $0x88] sm:$0xff]  }
 0x14d   :  { %1151 = vmatmul.mubr.bf16.vlgmr.msra.gmra.mrb[12].mxu1 %v337_v18 }
 0x14e   :  { %1054 = vmatpush1.bf16.msra.mxu0 %v1817_v19  ;;  %1636 = vmatpush3.bf16.msra.mxu1 %v1842_v35  ;;  %v1863_v19 = vld [vmem:[#allocation7 + $0xb0] sm:$0xff]  }
 0x14f   :  { %1055 = vmatprep.subr.bf16.mxu0 %v1822_v20  ;;  %1637 = vmatprep.subr.bf16.mxu1 %v1843_v36  ;;  %v1864_v20 = vld [vmem:[#allocation7 + $0xb8] sm:$0xff]  }
 0x152   :  { %1056 = vmatpush1.bf16.msra.mxu0 %v1820_v21  ;;  %1638 = vmatpush3.bf16.msra.mxu1 %v1844_v37 }
 0x153   :  { %1057 = vmatprep.subr.bf16.mxu0 %v1825_v22  ;;  %1639 = vmatprep.subr.bf16.mxu1 %v1845_v38 }
 0x156   :  { %1058 = vmatpush1.bf16.msra.mxu0 %v1823_v23  ;;  %1640 = vmatpush3.bf16.msra.mxu1 %v1846_v39 }
 0x157   :  { %1059 = vmatprep.subr.bf16.mxu0 %v1828_v24  ;;  %1641 = vmatprep.subr.bf16.mxu1 %v1847_v40 }
 0x15a   :  { %1060 = vmatpush1.bf16.msra.mxu0 %v1826_v25  ;;  %1642 = vmatpush3.bf16.msra.mxu1 %v1848_v41 }
 0x15b   :  { %1061 = vmatprep.subr.bf16.mxu0 %v1831_v26  ;;  %1643 = vmatprep.subr.bf16.mxu1 %v1849_v42 }
 0x15e   :  { %1062 = vmatpush1.bf16.msra.mxu0 %v1829_v27  ;;  %1644 = vmatpush3.bf16.msra.mxu1 %v1850_v43 }
 0x15f   :  { %1063 = vmatprep.subr.bf16.mxu0 %v1834_v28  ;;  %1645 = vmatprep.subr.bf16.mxu1 %v1851_v44  ;;  %v1566_v28 = vld [vmem:[%s2129_s8] ss:$0 sm:$0xff] }
 0x162   :  { %1064 = vmatpush1.bf16.msra.mxu0 %v1832_v29  ;;  %1646 = vmatpush3.bf16.msra.mxu1 %v1852_v45 }
 0x163   :  { %1065 = vmatprep.subr.bf16.mxu0 %v1837_v30  ;;  %1647 = vmatprep.subr.bf16.mxu1 %v1853_v46 }
 0x166   :  { %1066 = vmatpush1.bf16.msra.mxu0 %v1835_v31  ;;  %1648 = vmatpush3.bf16.msra.mxu1 %v1854_v47 }
 0x167   :  { %1067 = vmatprep.subr.bf16.mxu0 %v1840_v32  ;;  %1649 = vmatprep.subr.bf16.mxu1 %v1855_v48 }
 0x16a   :  { %1068 = vmatpush1.bf16.msra.mxu0 %v1838_v33  ;;  %1650 = vmatpush3.bf16.msra.mxu1 %v1856_v49 }
 0x16b   :  { %1666 = vmatprep.subr.bf16.mxu1 %v1970_v50 }
 0x16d   :  { %1070 = vmatmul.mubr.bf16.vlgmr.msra.gmra.mrb[8].mxu0 %v337_v18  ;;  %v1862_v18 = vld [vmem:[#allocation7 + $0xa8] sm:$0xff]  }
 0x200   :  { %v1607_v51 = vpop.f32.mrb[8].mxu1 }
 0x201   :  { %v1608_v52 = vpop.f32.mrb[9].mxu1 }
 0x202   :  { %v1609_v53 = vadd.f32 %v1608_v52, %v1607_v51  ;;  %v1610_v54 = vpop.f32.mrb[10].mxu1 }
 0x203   :  { %v1611_v55 = vpop.f32.mrb[11].mxu1 }
 0x204   :  { %v1113_v61 = vadd.f32 %v1609_v53, %v480_v57 }
 0x220   :  { %v1629_v58 = vpop.f32.mrb[12].mxu1 }
 0x221   :  { %v1630_v59 = vpop.f32.mrb[13].mxu1 }
 0x222   :  { %v1631_v62 = vadd.f32 %v1630_v59, %v1629_v58  ;;  %v1632_v63 = vpop.f32.mrb[14].mxu1 }
 0x223   :  { %v1633_v0 = vpop.f32.mrb[15].mxu1 }
 0x224   :  { %v1153_v1 = vadd.f32 %v1631_v62, %v1113_v61 }
 0x226   :  { %v1160_v21 = vmax.f32 %v1153_v1, 0.0 }
 0x228   :  { %v1163_v22 = vpack.c.bf16 %v1160_v21, %v1160_v21 }
 0x240   :  { %v1071_v5 = vpop.f32.mrb[8].mxu0 }
 0x241   :  { %v1686_v6 = vadd.f32 %v1071_v5, %v472_v2  ;;  %v1073_v7 = vpop.f32.mrb[9].mxu0 }
 0x242   :  { %v1687_v8 = vadd.f32 %v1073_v7, %v476_v3  ;;  %v1075_v9 = vpop.f32.mrb[10].mxu0 }
 0x243   :  { %v1158_v10 = vmax.f32 %v1686_v6, 0.0  ;;  %v1076_v60 = vpop.f32.mrb[11].mxu0 }
 0x244   :  { %v1159_v11 = vmax.f32 %v1687_v8, 0.0 }
 0x245   :  { %v1161_v15 = vpack.c.bf16 %v1158_v10, %v1158_v10 }
 0x246   :  { %v1162_v12 = vpack.c.bf16 %v1159_v11, %v1159_v11 }
 0x248   :  { %1395 = vmatprep.mubr.bf16.mxu1 %v1162_v12 }
 0x249   :  { %1396 = vmatmul.mubr.bf16.vlgmr.msra.gmra.mrb[16].mxu1 %v1161_v15 }
 0x24a   :  { %1667 = vmatpush3.bf16.msra.mxu1 %v1857_v14  ;;  %1682 = vmatprep.mubr.msk.bf16.mxu1 %vm1971_vm3, %v1970_v50 }
 0x24b   :  { %1668 = vmatprep.subr.bf16.mxu1 %v1970_v50 }
 0x24e   :  { %1669 = vmatpush3.bf16.msra.mxu1 %v1858_v17 }
 0x24f   :  { %1670 = vmatprep.subr.bf16.mxu1 %v1970_v50 }
 0x252   :  { %1671 = vmatpush3.bf16.msra.mxu1 %v1859_v4 }
 0x253   :  { %1672 = vmatprep.subr.bf16.mxu1 %v1970_v50 }
 0x256   :  { %1673 = vmatpush3.bf16.msra.mxu1 %v1860_v13 }
 0x257   :  { %1674 = vmatprep.subr.bf16.mxu1 %v1970_v50 }
 0x25a   :  { %1675 = vmatpush3.bf16.msra.mxu1 %v1861_v16 }
 0x25b   :  { %1676 = vmatprep.subr.bf16.mxu1 %v1970_v50 }
 0x25e   :  { %1677 = vmatpush3.bf16.msra.mxu1 %v1862_v18 }
 0x25f   :  { %1678 = vmatprep.subr.bf16.mxu1 %v1970_v50 }
 0x262   :  { %1679 = vmatpush3.bf16.msra.mxu1 %v1863_v19 }
 0x263   :  { %1680 = vmatprep.subr.bf16.mxu1 %v1970_v50 }
 0x266   :  { %1681 = vmatpush3.bf16.msra.mxu1 %v1864_v20 }
 0x269   :  { %1683 = vmatmul.mubr.bf16.vlgmr.msra.gmra.mrb[20].mxu1 %v1163_v22 }
 0x31c   :  { %v1651_v23 = vpop.f32.mrb[16].mxu1 }
 0x31d   :  { %v1652_v24 = vpop.f32.mrb[17].mxu1 }
 0x31e   :  { %v1653_v25 = vadd.f32 %v1652_v24, %v1651_v23  ;;  %v1654_v26 = vpop.f32.mrb[18].mxu1 }
 0x31f   :  { %v1655_v27 = vpop.f32.mrb[19].mxu1 }
 0x320   :  { %v1398_v29 = vadd.f32 %v1653_v25, %v1566_v28 }
 0x33c   :  { %v1437_v30 = vpop.f32.mrb[20].mxu1 }
 0x33d   :  { %v1438_v31 = vadd.f32 %v1437_v30, %v1398_v29  ;;  %v1684_v32 = vpop.f32.mrb[21].mxu1 }
 0x33e   :  { %v1440_v33 = vpop.f32.mrb[22].mxu1 }
 0x33f   :  { %1443 = vst [vmem:[#allocation8] sm:$0xff] %v1438_v31  ;;  %v1685_v34 = vpop.f32.mrb[23].mxu1 }
 0x340   :  { %1942 = shalt.err (!%p1939_p0)
}
 0x341   :  { %s1943_s8 = scalar_lea.hbm %s2130_s9, 128 }
 0x342   :  { %p1944_p1 = scmp.ne.s32.totalorder %s2130_s9, %s1943_s8  ;;  %p1947_p2 = scmp.lt.u32.totalorder %s1943_s8, %s2130_s9 }
 0x344   :  { %p1949_p3 = pnand %p1947_p2, %p1944_p1 }
 0x346   :  { %1952 = shalt.err (!%p1949_p3)
}
 0x347   :  { %1453 = dma.vmem_to_hbm [thread:$0]  %s1451_s13, 128, %s2130_s9, [#allocation4]  }
 0x348   :  { %1957 = dma.done.wait [#allocation4], 128  }
 0x349   :  { %1958 = vsyncadd [#allocation4], 4294967168 }
 0x34a   :  { %1457 = vsyncpa [#allocation3], 1 }
 0x34b   :  { %1458 = vsyncpa [#allocation6], 1 }
 0x34c   :  { %1459 = vsyncpa [#allocation4], 1 }

</bundles_post_ra>
